<compile_context>
chip_gen: v5e
topology: v5e:2x2
jax: 0.10.0
libtpu: 0.0.40
codegen_flags: <defaults>
</compile_context>

<pallas_src>
from functools import partial

import jax
import jax.numpy as jnp
from jax.experimental import pallas as pl
from jax.experimental.pallas import tpu as pltpu


def _head_kernel(x_ref, w_ref, b_ref, o_ref):
    # x_ref: (tm, G*D)   w_ref: (G*D, G*patch_len)   b_ref: (1, G*patch_len) f32
    # o_ref: (tm, G*patch_len)   -- lane-dense (N >= 128) output block
    acc = jnp.dot(x_ref[...], w_ref[...], preferred_element_type=jnp.float32)
    o_ref[...] = (acc + b_ref[...]).astype(o_ref.dtype)


def _vmem_budgets():
    """(scoped row-block budget, vmem_limit ceiling) per TPU generation."""
    cap = None
    try:
        info = pltpu.get_tpu_info()
        for attr in ("vmem_capacity_bytes", "vmem_size_bytes", "vmem_bytes"):
            v = getattr(info, attr, None)
            if v:
                cap = int(v)
                break
    except Exception:
        cap = None
    if cap is not None and cap >= 100 * 1024 * 1024:      # v5e / v6e: 128 MiB VMEM
        return 40 * 1024 * 1024, 64 * 1024 * 1024
    # v7x (64 MiB per TensorCore) or unknown generation: stay conservative.
    return 14 * 1024 * 1024, 28 * 1024 * 1024


_SCOPED_BUDGET, _VMEM_LIMIT_CAP = _vmem_budgets()


def _pick_group(p, d, patch_len, itemsize):
    """Number of consecutive patches fused into one lane-dense matmul column block."""
    g_max = max(1, 128 // patch_len)                       # target N = G*patch_len >= 128
    # Keep the block-diagonal weight modest: it lives (double-buffered) in VMEM.
    while g_max > 1 and (g_max * d) * (g_max * patch_len) * itemsize > 4 * (1 << 20):
        g_max //= 2
    for g in range(min(g_max, p), 0, -1):
        if p % g == 0:                                     # groups must not straddle channels
            return g
    return 1


def _pick_tile_rows(m, bytes_per_row, row_budget):
    """Rows per grid step: multiple of 8 (or == m), sized by bytes not row count."""
    if m <= 8:
        return m
    tm = (row_budget // (2 * bytes_per_row)) // 8 * 8      # double-buffered in+out blocks
    tm = max(8, tm)
    full = m if m < 16 else (m // 8) * 8
    tm = min(tm, full)
    # Keep >= 2 grid steps when possible so both v7x TensorCores get work.
    if m >= 16 and 2 * tm > m:
        tm = max(8, (m // 2) // 8 * 8)
    # Prefer an even step count (megacore sharding of the single parallel axis).
    steps = pl.cdiv(m, tm)
    if steps > 2 and steps % 2 == 1:
        alt = max(8, ((pl.cdiv(m, steps + 1) + 7) // 8) * 8)
        if pl.cdiv(m, alt) % 2 == 0:
            tm = alt
    return tm


@partial(jax.jit, static_argnames=("compute_dtype",))
def pretrain_head(x, weight, bias, *, compute_dtype=jnp.bfloat16):
    """x: [B, C, P, D]; weight: [patch_len, D]; bias: [patch_len].

    Returns [B, C, P * patch_len] in x.dtype (eval-mode dropout == identity).
    Matmul runs in `compute_dtype` (default bf16) with f32 accumulation.
    """
    B, C, P, D = x.shape
    patch_len = weight.shape[0]
    seq_len = P * patch_len
    out_dtype = x.dtype
    cdt = jnp.dtype(compute_dtype) if compute_dtype is not None else jnp.dtype(x.dtype)
    in_item = cdt.itemsize
    out_item = jnp.dtype(out_dtype).itemsize

    G = _pick_group(P, D, patch_len, in_item)
    GD, GPL = G * D, G * patch_len
    M = (B * C * P) // G                                   # G divides P

    # Row-major-compatible reshapes: no HBM copies.
    x2 = x.reshape(M, GD).astype(cdt)
    w_t = weight.T.astype(cdt)                             # (D, patch_len)
    # Block-diagonal weight: G copies of W^T on the diagonal -> one fused matmul
    # whose output columns are already in flattened [patch, patch_len] order.
    w_blk = (jnp.eye(G, dtype=cdt)[:, None, :, None]
             * w_t[None, :, None, :]).reshape(GD, GPL)
    b_blk = jnp.tile(bias.reshape(1, patch_len).astype(jnp.float32), (1, G))

    row_bytes = GD * in_item + GPL * out_item
    w_bytes = GD * GPL * in_item
    row_budget = max(2 * (1 << 20),
                     min(_SCOPED_BUDGET, _VMEM_LIMIT_CAP - 2 * w_bytes - 2 * (1 << 20)))
    tm = _pick_tile_rows(M, row_bytes, row_budget)
    grid = (pl.cdiv(M, tm),)                               # partial trailing block OK

    tile_bytes = (2 * tm * row_bytes                       # double-buffered x + out blocks
                  + 2 * w_bytes                            # grid-constant weight (2 buffers)
                  + 2 * GPL * 4                            # bias
                  + (1 << 20))                             # slack
    vmem_limit = int(min(max(tile_bytes, 16 * 1024 * 1024), _VMEM_LIMIT_CAP))

    cost = pl.CostEstimate(
        flops=2 * M * GD * GPL,                            # MXU work actually issued
        transcendentals=0,
        bytes_accessed=(M * GD * in_item + M * GPL * out_item
                        + GD * GPL * in_item + GPL * 4),
    )

    out2 = pl.pallas_call(
        _head_kernel,
        out_shape=jax.ShapeDtypeStruct((M, GPL), out_dtype),
        grid_spec=pltpu.PrefetchScalarGridSpec(
            num_scalar_prefetch=0,
            grid=grid,
            in_specs=[
                pl.BlockSpec((tm, GD), lambda i: (i, 0)),   # grouped x rows
                pl.BlockSpec((GD, GPL), lambda i: (0, 0)),  # block-diag W^T (grid-constant)
                pl.BlockSpec((1, GPL), lambda i: (0, 0)),   # tiled bias (f32)
            ],
            out_specs=pl.BlockSpec((tm, GPL), lambda i: (i, 0)),
        ),
        compiler_params=pltpu.CompilerParams(
            dimension_semantics=("parallel",),
            vmem_limit_bytes=vmem_limit,
        ),
        cost_estimate=cost,
    )(x2, w_blk, b_blk)

    return out2.reshape(B, C, seq_len)


def init_params(key, d_model, patch_len, orth_gain=1.41):
    """Orthogonal init of Linear(d_model -> patch_len) weight, zero bias
    (mirrors torch.nn.init.orthogonal_(W, gain) + bias.zero_())."""
    a = jax.random.normal(key, (d_model, patch_len), dtype=jnp.float32)
    q, r = jnp.linalg.qr(a)                                # orthonormal columns
    q = q * jnp.sign(jnp.diag(r))[None, :]                 # sign fix, as torch does
    weight = (orth_gain * q.T).astype(jnp.float32)         # (patch_len, d_model)
    bias = jnp.zeros((patch_len,), dtype=jnp.float32)
    return weight, bias


if __name__ == "__main__":
    # Small shapes consistent with the module's forward contract.
    B, C, P, D = 2, 4, 16, 64          # batch, n_channels, n_patches, d_model
    patch_len = 8                      # seq_len = P * patch_len = 128 (lane-dense)

    key = jax.random.PRNGKey(0)
    kx, kw, kb = jax.random.split(key, 3)
    x = jax.random.normal(kx, (B, C, P, D), dtype=jnp.float32)
    weight, _zero_bias = init_params(kw, D, patch_len)
    # Nonzero bias to exercise the bias-add path (module init zeroes it, but
    # forward semantics must hold for arbitrary bias).
    bias = 0.1 * jax.random.normal(kb, (patch_len,), dtype=jnp.float32)

    out = pretrain_head(x, weight, bias)
    out = jax.block_until_ready(out)

    # Reference (eval-mode dropout == identity) using the same bf16 compute
    # dtype as the kernel, with f32 accumulation.
    xb = x.astype(jnp.bfloat16).astype(jnp.float32)
    wb = weight.astype(jnp.bfloat16).astype(jnp.float32)
    ref = (jnp.einsum("bcpd,kd->bcpk", xb, wb,
                      precision=jax.lax.Precision.HIGHEST) + bias
           ).reshape(B, C, P * patch_len)

    assert out.shape == (B, C, P * patch_len)
    err = float(jnp.max(jnp.abs(out.astype(jnp.float32) - ref)))
    assert err < 1e-2, err

    print("KERNEL_OK")
</pallas_src>

<mosaic_0001>
module attributes {stable_mosaic.version = 11 : i64} {
  func.func @_head_kernel(%arg0: i32, %arg1: memref<8x1024xbf16, #tpu.memory_space<vmem>>, %arg2: memref<1024x128xbf16, #tpu.memory_space<vmem>>, %arg3: memref<1x128xf32, #tpu.memory_space<vmem>>, %arg4: memref<8x128xf32, #tpu.memory_space<vmem>>) attributes {dimension_semantics = [#tpu.dimension_semantics<parallel>], iteration_bounds = array<i64: 1>, scalar_prefetch = 0 : i64, scratch_operands = 0 : i64, tpu.core_type = #tpu.core_type<tc>, window_params = [{transform_indices = @transform_0, window_bounds = array<i64: 8, 1024>}, {pipeline_mode = #tpu.pipeline_mode<synchronous>, transform_indices = @transform_1, window_bounds = array<i64: 1024, 128>}, {pipeline_mode = #tpu.pipeline_mode<synchronous>, transform_indices = @transform_2, window_bounds = array<i64: 1, 128>}, {transform_indices = @transform_3, window_bounds = array<i64: 8, 128>}]} {
    %c0 = arith.constant 0 : index
    %c0_0 = arith.constant 0 : index
    %0 = vector.load %arg1[%c0, %c0_0] : memref<8x1024xbf16, #tpu.memory_space<vmem>>, vector<8x1024xbf16>
    %c0_1 = arith.constant 0 : index
    %c0_2 = arith.constant 0 : index
    %1 = vector.load %arg2[%c0_1, %c0_2] : memref<1024x128xbf16, #tpu.memory_space<vmem>>, vector<1024x128xbf16>
    %cst = arith.constant dense<0.000000e+00> : vector<8x128xf32>
    %2 = tpu.matmul %0, %1, %cst {dimension_numbers = #tpu.dot_dimension_numbers<[1], [0], [0], [1], [0, 0, 1, 1], [], []>} : vector<8x1024xbf16>, vector<1024x128xbf16>, vector<8x128xf32> -> vector<8x128xf32>
    %c0_3 = arith.constant 0 : index
    %c0_4 = arith.constant 0 : index
    %3 = vector.load %arg3[%c0_3, %c0_4] : memref<1x128xf32, #tpu.memory_space<vmem>>, vector<1x128xf32>
    %4 = vector.broadcast %3 : vector<1x128xf32> to vector<8x128xf32>
    %5 = arith.addf %2, %4 : vector<8x128xf32>
    %c0_5 = arith.constant 0 : index
    %c0_6 = arith.constant 0 : index
    %6 = vector.load %arg4[%c0_5, %c0_6] : memref<8x128xf32, #tpu.memory_space<vmem>>, vector<8x128xf32>
    tpu.vector_store %arg4[%c0_5, %c0_6], %5 {strides = array<i32>} : memref<8x128xf32, #tpu.memory_space<vmem>>, vector<8x128xf32>,
    return
  }
  func.func @transform_0(%arg0: i32) -> (i32, i32) {
    %c0_i32 = arith.constant 0 : i32
    %c0_i32_0 = arith.constant 0 : i32
    return %arg0, %c0_i32 : i32, i32
  }
  func.func @transform_1(%arg0: i32) -> (i32, i32) {
    %c0_i32 = arith.constant 0 : i32
    %c0_i32_0 = arith.constant 0 : i32
    %c0_i32_1 = arith.constant 0 : i32
    return %c0_i32, %c0_i32_0 : i32, i32
  }
  func.func @transform_2(%arg0: i32) -> (i32, i32) {
    %c0_i32 = arith.constant 0 : i32
    %c0_i32_0 = arith.constant 0 : i32
    %c0_i32_1 = arith.constant 0 : i32
    return %c0_i32, %c0_i32_0 : i32, i32
  }
  func.func @transform_3(%arg0: i32) -> (i32, i32) {
    %c0_i32 = arith.constant 0 : i32
    %c0_i32_0 = arith.constant 0 : i32
    return %arg0, %c0_i32 : i32, i32
  }
}

</mosaic_0001>

<bundles_post_ra>
// kernel: pretrain_head.1
= control target key start
LH: loop header
LB: loop body
LE: loop exit
PB: predicated region body
PF: predicated region fallthrough
CT: control target
= control target key end

     0   :  { %s1263_s0 = inlined_call_operand.vmem [shape: bf16[8,1024], index: 0, kind: input, shape index: {}]   ;;  %s1264_s1 = inlined_call_operand.vmem [shape: bf16[1024,128], index: 1, kind: input, shape index: {}]   ;;  %s1265_s2 = inlined_call_operand.vmem [shape: f32[1,128], index: 2, kind: input, shape index: {}]   ;;  %s1266_s3 = inlined_call_operand.hbm [shape: f32[8,128], index: 3, kind: output, shape index: {}]  }
   0x1   :  { %v947_v0 = vld [vmem:[%s1264_s1 + $0x38] sm:$0xff]  ;;  %v946_v4 = vld [vmem:[%s1264_s1 + $0x30] sm:$0xff]  ;;  %v945_v8 = vld [vmem:[%s1264_s1 + $0x28] sm:$0xff] }
   0x2   :  { %v955_v1 = vld [vmem:[%s1264_s1 + $0x78] sm:$0xff]  ;;  %563 = vmatpush.bf16.msra.mxu0 %v947_v0  ;;  %v954_v5 = vld [vmem:[%s1264_s1 + $0x70] sm:$0xff]  ;;  %v953_v9 = vld [vmem:[%s1264_s1 + $0x68] sm:$0xff] }
   0x3   :  { %v963_v2 = vld [vmem:[%s1264_s1 + $0xb8] sm:$0xff]  ;;  %576 = vmatpush.bf16.msra.mxu1 %v955_v1  ;;  %v962_v6 = vld [vmem:[%s1264_s1 + $0xb0] sm:$0xff]  ;;  %v961_v10 = vld [vmem:[%s1264_s1 + $0xa8] sm:$0xff] }
   0x4   :  { %v971_v3 = vld [vmem:[%s1264_s1 + $0xf8] sm:$0xff]  ;;  %589 = vmatpush.bf16.msra.mxu2 %v963_v2  ;;  %v970_v7 = vld [vmem:[%s1264_s1 + $0xf0] sm:$0xff]  ;;  %v969_v11 = vld [vmem:[%s1264_s1 + $0xe8] sm:$0xff] }
   0x5   :  { %602 = vmatpush.bf16.msra.mxu3 %v971_v3  ;;  %v944_v12 = vld [vmem:[%s1264_s1 + $0x20] sm:$0xff]  ;;  %v943_v16 = vld [vmem:[%s1264_s1 + $0x18] sm:$0xff]  ;;  %v942_v20 = vld [vmem:[%s1264_s1 + $0x10] sm:$0xff] }
   0x6   :  { %564 = vmatpush.bf16.msra.mxu0 %v946_v4  ;;  %v952_v13 = vld [vmem:[%s1264_s1 + $0x60] sm:$0xff]  ;;  %v951_v17 = vld [vmem:[%s1264_s1 + $0x58] sm:$0xff]  ;;  %v950_v21 = vld [vmem:[%s1264_s1 + $0x50] sm:$0xff] }
   0x7   :  { %577 = vmatpush.bf16.msra.mxu1 %v954_v5  ;;  %v960_v14 = vld [vmem:[%s1264_s1 + $0xa0] sm:$0xff]  ;;  %v959_v18 = vld [vmem:[%s1264_s1 + $0x98] sm:$0xff] }
   0x8   :  { %590 = vmatpush.bf16.msra.mxu2 %v962_v6  ;;  %v968_v15 = vld [vmem:[%s1264_s1 + $0xe0] sm:$0xff]  ;;  %v967_v19 = vld [vmem:[%s1264_s1 + $0xd8] sm:$0xff] }
   0x9   :  { %603 = vmatpush.bf16.msra.mxu3 %v970_v7 }
   0xa   :  { %565 = vmatpush.bf16.msra.mxu0 %v945_v8 }
   0xb   :  { %578 = vmatpush.bf16.msra.mxu1 %v953_v9 }
   0xc   :  { %591 = vmatpush.bf16.msra.mxu2 %v961_v10 }
   0xd   :  { %604 = vmatpush.bf16.msra.mxu3 %v969_v11 }
   0xe   :  { %566 = vmatpush.bf16.msra.mxu0 %v944_v12 }
   0xf   :  { %579 = vmatpush.bf16.msra.mxu1 %v952_v13 }
  0x10   :  { %592 = vmatpush.bf16.msra.mxu2 %v960_v14 }
  0x11   :  { %605 = vmatpush.bf16.msra.mxu3 %v968_v15 }
  0x12   :  { %567 = vmatpush.bf16.msra.mxu0 %v943_v16 }
  0x13   :  { %580 = vmatpush.bf16.msra.mxu1 %v951_v17 }
  0x14   :  { %8 = vsyncpa [#allocation3], 0  ;;  %593 = vmatpush.bf16.msra.mxu2 %v959_v18  ;;  %v958_v22 = vld [vmem:[%s1264_s1 + $0x90] sm:$0xff]  ;;  %v941_v24 = vld [vmem:[%s1264_s1 + $0x8] sm:$0xff]  ;;  %s1032_s13 = smov [#allocation2]   ;;  %s675_s17 = sshll.u32 %s1266_s3, 4  ;;  %s676_s17 = int_to_ptr.hbm [resolvable:$true] %s675_s17 }
  0x15   :  { %606 = vmatpush.bf16.msra.mxu3 %v967_v19  ;;  %v966_v23 = vld [vmem:[%s1264_s1 + $0xd0] sm:$0xff]  ;;  %v949_v25 = vld [vmem:[%s1264_s1 + $0x48] sm:$0xff]  ;;  %v15_v29 = vld [vmem:[%s1263_s0] sm:$0xff]  ;;  %s673_s14 = sshll.u32 %s1032_s13, 4  ;;  %s674_s14 = int_to_ptr.vmem [resolvable:$true] %s673_s14 }
  0x16   :  { %568 = vmatpush.bf16.msra.mxu0 %v942_v20  ;;  %v957_v26 = vld [vmem:[%s1264_s1 + $0x88] sm:$0xff]  ;;  %v940_v30 = vld [vmem:[%s1264_s1] sm:$0xff]  ;;  %v155_v36 = vunpack.c.l.b16 %v15_v29  ;;  %v156_v37 = vunpack.c.h.b16 %v15_v29  ;;  %v979_v38 = vld [vmem:[%s1264_s1 + $0x138] sm:$0xff] }
  0x17   :  { %581 = vmatpush.bf16.msra.mxu1 %v950_v21  ;;  %v965_v27 = vld [vmem:[%s1264_s1 + $0xc8] sm:$0xff]  ;;  %v948_v31 = vld [vmem:[%s1264_s1 + $0x40] sm:$0xff]  ;;  %v987_v39 = vld [vmem:[%s1264_s1 + $0x178] sm:$0xff] }
  0x18   :  { %594 = vmatpush.bf16.msra.mxu2 %v958_v22  ;;  %v16_v28 = vld [vmem:[%s1263_s0 + $0x8] sm:$0xff]  ;;  %v956_v34 = vld [vmem:[%s1264_s1 + $0x80] sm:$0xff]  ;;  %v995_v40 = vld [vmem:[%s1264_s1 + $0x1b8] sm:$0xff]  ;;  %v163_v44 = vpack.c.b16 %v155_v36, %v155_v36  ;;  %v164_v45 = vpack.c.b16 %v156_v37, %v156_v37 }
  0x19   :  { %607 = vmatpush.bf16.msra.mxu3 %v966_v23  ;;  %v157_v32 = vunpack.c.l.b16 %v16_v28  ;;  %v158_v33 = vunpack.c.h.b16 %v16_v28  ;;  %v964_v35 = vld [vmem:[%s1264_s1 + $0xc0] sm:$0xff]  ;;  %v1003_v41 = vld [vmem:[%s1264_s1 + $0x1f8] sm:$0xff]  ;;  %v978_v46 = vld [vmem:[%s1264_s1 + $0x130] sm:$0xff] }
  0x1a   :  { %569 = vmatpush.bf16.msra.mxu0 %v941_v24  ;;  %v986_v47 = vld [vmem:[%s1264_s1 + $0x170] sm:$0xff]  ;;  %v977_v50 = vld [vmem:[%s1264_s1 + $0x128] sm:$0xff]  ;;  %v976_v54 = vld [vmem:[%s1264_s1 + $0x120] sm:$0xff] }
  0x1b   :  { %582 = vmatpush.bf16.msra.mxu1 %v949_v25  ;;  %v165_v42 = vpack.c.b16 %v157_v32, %v157_v32  ;;  %v166_v43 = vpack.c.b16 %v158_v33, %v158_v33  ;;  %v994_v48 = vld [vmem:[%s1264_s1 + $0x1b0] sm:$0xff]  ;;  %v985_v51 = vld [vmem:[%s1264_s1 + $0x168] sm:$0xff]  ;;  %v984_v55 = vld [vmem:[%s1264_s1 + $0x160] sm:$0xff] }
  0x1c   :  { %595 = vmatpush.bf16.msra.mxu2 %v957_v26  ;;  %v1002_v49 = vld [vmem:[%s1264_s1 + $0x1f0] sm:$0xff]  ;;  %v993_v52 = vld [vmem:[%s1264_s1 + $0x1a8] sm:$0xff]  ;;  %v992_v56 = vld [vmem:[%s1264_s1 + $0x1a0] sm:$0xff] }
  0x1d   :  { %608 = vmatpush.bf16.msra.mxu3 %v965_v27  ;;  %v1001_v53 = vld [vmem:[%s1264_s1 + $0x1e8] sm:$0xff]  ;;  %v1000_v57 = vld [vmem:[%s1264_s1 + $0x1e0] sm:$0xff]  ;;  %v975_v58 = vld [vmem:[%s1264_s1 + $0x118] sm:$0xff] }
  0x1e   :  { %570 = vmatpush.bf16.msra.mxu0 %v940_v30  ;;  %v983_v59 = vld [vmem:[%s1264_s1 + $0x158] sm:$0xff]  ;;  %v974_v62 = vld [vmem:[%s1264_s1 + $0x110] sm:$0xff]  ;;  %v973_v2 = vld [vmem:[%s1264_s1 + $0x108] sm:$0xff] }
  0x1f   :  { %583 = vmatpush.bf16.msra.mxu1 %v948_v31  ;;  %v991_v60 = vld [vmem:[%s1264_s1 + $0x198] sm:$0xff]  ;;  %v982_v63 = vld [vmem:[%s1264_s1 + $0x150] sm:$0xff]  ;;  %v981_v3 = vld [vmem:[%s1264_s1 + $0x148] sm:$0xff] }
  0x20   :  { %596 = vmatpush.bf16.msra.mxu2 %v956_v34  ;;  %v999_v61 = vld [vmem:[%s1264_s1 + $0x1d8] sm:$0xff]  ;;  %v990_v0 = vld [vmem:[%s1264_s1 + $0x190] sm:$0xff]  ;;  %v989_v5 = vld [vmem:[%s1264_s1 + $0x188] sm:$0xff] }
  0x21   :  { %609 = vmatpush.bf16.msra.mxu3 %v964_v35  ;;  %571 = vmatmul.bf16.vlgmr.msra.gmra.mxu0 %v163_v44  ;;  %v998_v1 = vld [vmem:[%s1264_s1 + $0x1d0] sm:$0xff]  ;;  %v997_v6 = vld [vmem:[%s1264_s1 + $0x1c8] sm:$0xff]  ;;  %v18_v7 = vld [vmem:[%s1263_s0 + $0x18] sm:$0xff] }
  0x22   :  { %615 = vmatpush.bf16.msrb.mxu0 %v979_v38  ;;  %584 = vmatmul.bf16.vlgmr.msra.gmra.mxu1 %v164_v45  ;;  %v17_v4 = vld [vmem:[%s1263_s0 + $0x10] sm:$0xff]  ;;  %v972_v10 = vld [vmem:[%s1264_s1 + $0x100] sm:$0xff]  ;;  %v161_v12 = vunpack.c.l.b16 %v18_v7  ;;  %v162_v13 = vunpack.c.h.b16 %v18_v7 }
  0x23   :  { %628 = vmatpush.bf16.msrb.mxu1 %v987_v39  ;;  %597 = vmatmul.bf16.vlgmr.msra.gmra.mxu2 %v165_v42  ;;  %v159_v8 = vunpack.c.l.b16 %v17_v4  ;;  %v160_v9 = vunpack.c.h.b16 %v17_v4  ;;  %v980_v11 = vld [vmem:[%s1264_s1 + $0x140] sm:$0xff] }
  0x24   :  { %641 = vmatpush.bf16.msrb.mxu2 %v995_v40  ;;  %610 = vmatmul.bf16.vlgmr.msra.gmra.mxu3 %v166_v43  ;;  %v988_v14 = vld [vmem:[%s1264_s1 + $0x180] sm:$0xff]  ;;  %v169_v18 = vpack.c.b16 %v161_v12, %v161_v12  ;;  %v170_v19 = vpack.c.b16 %v162_v13, %v162_v13 }
  0x25   :  { %654 = vmatpush.bf16.msrb.mxu3 %v1003_v41  ;;  %v996_v15 = vld [vmem:[%s1264_s1 + $0x1c0] sm:$0xff]  ;;  %v167_v16 = vpack.c.b16 %v159_v8, %v159_v8  ;;  %v168_v17 = vpack.c.b16 %v160_v9, %v160_v9 }
  0x26   :  { %616 = vmatpush.bf16.msrb.mxu0 %v978_v46  ;;  %v1005_v26 = vld [vmem:[%s1265_s2] ss:$0 sm:$0xff] }
  0x27   :  { %629 = vmatpush.bf16.msrb.mxu1 %v986_v47 }
  0x28   :  { %642 = vmatpush.bf16.msrb.mxu2 %v994_v48 }
  0x29   :  { %655 = vmatpush.bf16.msrb.mxu3 %v1002_v49 }
  0x2a   :  { %617 = vmatpush.bf16.msrb.mxu0 %v977_v50 }
  0x2b   :  { %630 = vmatpush.bf16.msrb.mxu1 %v985_v51 }
  0x2c   :  { %643 = vmatpush.bf16.msrb.mxu2 %v993_v52 }
  0x2d   :  { %656 = vmatpush.bf16.msrb.mxu3 %v1001_v53 }
  0x2e   :  { %618 = vmatpush.bf16.msrb.mxu0 %v976_v54 }
  0x2f   :  { %631 = vmatpush.bf16.msrb.mxu1 %v984_v55 }
  0x30   :  { %644 = vmatpush.bf16.msrb.mxu2 %v992_v56 }
  0x31   :  { %657 = vmatpush.bf16.msrb.mxu3 %v1000_v57 }
  0x32   :  { %619 = vmatpush.bf16.msrb.mxu0 %v975_v58 }
  0x33   :  { %632 = vmatpush.bf16.msrb.mxu1 %v983_v59 }
  0x34   :  { %645 = vmatpush.bf16.msrb.mxu2 %v991_v60 }
  0x35   :  { %658 = vmatpush.bf16.msrb.mxu3 %v999_v61 }
  0x36   :  { %620 = vmatpush.bf16.msrb.mxu0 %v974_v62 }
  0x37   :  { %633 = vmatpush.bf16.msrb.mxu1 %v982_v63 }
  0x38   :  { %646 = vmatpush.bf16.msrb.mxu2 %v990_v0 }
  0x39   :  { %659 = vmatpush.bf16.msrb.mxu3 %v998_v1 }
  0x3a   :  { %621 = vmatpush.bf16.msrb.mxu0 %v973_v2 }
  0x3b   :  { %634 = vmatpush.bf16.msrb.mxu1 %v981_v3 }
  0x3c   :  { %647 = vmatpush.bf16.msrb.mxu2 %v989_v5 }
  0x3d   :  { %660 = vmatpush.bf16.msrb.mxu3 %v997_v6 }
  0x3e   :  { %622 = vmatpush.bf16.msrb.mxu0 %v972_v10 }
  0x3f   :  { %635 = vmatpush.bf16.msrb.mxu1 %v980_v11 }
  0x40   :  { %648 = vmatpush.bf16.msrb.mxu2 %v988_v14 }
  0x41   :  { %661 = vmatpush.bf16.msrb.mxu3 %v996_v15  ;;  %623 = vmatmul.bf16.vlgmr.msrb.gmra.mxu0 %v167_v16 }
  0x42   :  { %636 = vmatmul.bf16.vlgmr.msrb.gmra.mxu1 %v168_v17 }
  0x43   :  { %649 = vmatmul.bf16.vlgmr.msrb.gmra.mxu2 %v169_v18 }
  0x44   :  { %662 = vmatmul.bf16.vlgmr.msrb.gmra.mxu3 %v170_v19 }
  0x9e   :  { %v572_v20 = vpop.f32.mrf.mxu0 }
  0x9f   :  { %v585_v21 = vpop.f32.mrf.mxu1  ;;  %v573_v29 = vadd.f32 %v1005_v26, %v572_v20 }
  0xa1   :  { %v586_v30 = vadd.f32 %v585_v21, %v573_v29 }
  0xa6   :  { %v598_v22 = vpop.f32.mrf.mxu2  ;;  %v574_v24 = vpop.f32.mrf.mxu0 }
  0xa7   :  { %v611_v23 = vpop.f32.mrf.mxu3  ;;  %v587_v25 = vpop.f32.mrf.mxu1  ;;  %v599_v31 = vadd.f32 %v598_v22, %v586_v30 }
  0xa9   :  { %v612_v32 = vadd.f32 %v611_v23, %v599_v31 }
  0xae   :  { %v600_v27 = vpop.f32.mrf.mxu2 }
  0xaf   :  { %v613_v28 = vpop.f32.mrf.mxu3 }
  0xbe   :  { %v624_v33 = vpop.f32.mrf.mxu0 }
  0xbf   :  { %v637_v34 = vpop.f32.mrf.mxu1  ;;  %v625_v35 = vadd.f32 %v624_v33, %v612_v32 }
  0xc1   :  { %v638_v36 = vadd.f32 %v637_v34, %v625_v35 }
  0xc6   :  { %v650_v37 = vpop.f32.mrf.mxu2  ;;  %v626_v40 = vpop.f32.mrf.mxu0 }
  0xc7   :  { %v663_v38 = vpop.f32.mrf.mxu3  ;;  %v651_v39 = vadd.f32 %v650_v37, %v638_v36  ;;  %v639_v41 = vpop.f32.mrf.mxu1 }
  0xc9   :  { %v664_v42 = vadd.f32 %v663_v38, %v651_v39 }
  0xcb   :  { %667 = vst [vmem:[#allocation2] sm:$0xff] %v664_v42 }
  0xcc   :  { %678 = dma.vmem_to_hbm [thread:$0]  %s674_s14, 128, %s676_s17, [#allocation3]  }
  0xce   :  { %v652_v43 = vpop.f32.mrf.mxu2 }
  0xcf   :  { %v665_v44 = vpop.f32.mrf.mxu3 }
  0xd0   :  { %1030 = dma.done.wait [#allocation3], 128  }
  0xd1   :  { %1031 = vsyncadd [#allocation3], 4294967168 }
  0xd2   :  { %683 = vsyncpa [#allocation3], 1 }

</bundles_post_ra>
